<compile_context>
chip_gen: v5e
topology: v5e:2x2
jax: 0.10.0
libtpu: 0.0.40
codegen_flags: <defaults>
</compile_context>

<pallas_src>
import jax
import jax.numpy as jnp
from jax.experimental import pallas as pl
from jax.experimental.pallas import tpu as pltpu


def linear_kernel(x_ref, w_ref, b_ref, o_ref):
    # x_ref: (TM, D) VMEM, w_ref: (1, D) VMEM, b_ref: (1,) SMEM, o_ref: (1, TM) VMEM.
    x = x_ref[...]                               # (TM, D) f32
    w = w_ref[...]                               # (1,  D) f32
    # VPU elementwise multiply + XLU lane reduce (keeps the MXU out of a
    # 1-column job; both units are idle slack in a mem-bound kernel anyway).
    row = jnp.sum(x * w, axis=-1) + b_ref[0]     # (TM,) f32
    # Lane-dense store: one unmasked (1, TM) row instead of TM/8 masked
    # single-lane column stores.
    o_ref[...] = row[None, :].astype(o_ref.dtype)


def _round_up(n, m):
    return ((n + m - 1) // m) * m


def linear_forward(x, weight, bias, *, tm=2048):
    """Pallas equivalent of torch.nn.Linear(input_dim, 1).forward.

    x:      (batch, input_dim) f32
    weight: (1, input_dim)     f32  (PyTorch layout, used as-is)
    bias:   (1,)               f32
    returns (batch, 1)         f32
    """
    batch, input_dim = x.shape
    itemsize = jnp.dtype(x.dtype).itemsize

    # ---- generation-aware VMEM budget -------------------------------------
    try:
        vmem_cap = int(pltpu.get_tpu_info().vmem_capacity_bytes)
    except Exception:  # e.g. not running on a TPU backend at trace time
        vmem_cap = 64 * 1024 * 1024
    # ~64 MiB scoped limit on v5e/v6e (128 MiB physical), ~48 MiB on v7x
    # (64 MiB physical) — never sized as if every chip had 128 MiB.
    vmem_limit = min((vmem_cap * 3) // 4, 64 * 1024 * 1024)

    # Non-x residents: weight block is sublane-padded to 8 rows and
    # double-buffered; the (1, TM) output block is double-buffered; plus
    # headroom for compiler-internal scratch.
    w_bytes = 2 * 8 * input_dim * itemsize
    out_bytes = 2 * max(tm, 128) * itemsize
    headroom = 2 * 1024 * 1024
    x_budget = max(vmem_limit - w_bytes - out_bytes - headroom, 1 * 1024 * 1024)

    # x stream is double-buffered: per-buffer budget -> max rows per tile.
    max_tm = max(8, x_budget // (2 * input_dim * itemsize))
    tm = min(tm, max_tm)

    # ---- tile-row selection -------------------------------------------------
    if batch <= tm:
        if batch >= 256:
            # Guarantee >=2 grid steps so the "parallel" axis can use both
            # TensorCores on v7x; keep TM a multiple of 128 for the lane-dense
            # output block constraint.
            tm = _round_up(pl.cdiv(batch, 2), 128)
        else:
            tm = batch  # single full-extent block: always legal, grid=(1,)
    else:
        # Multi-tile: TM must be a multiple of 128 (lane-dense output block)
        # which also satisfies the (8, ·) sublane constraint on the x block.
        tm = max(128, (tm // 128) * 128)

    num_tiles = pl.cdiv(batch, tm)
    padded = num_tiles * tm

    cost = pl.CostEstimate(
        flops=2 * batch * input_dim,
        transcendentals=0,
        bytes_accessed=(batch * input_dim + input_dim + batch + 1) * itemsize,
    )

    out = pl.pallas_call(
        linear_kernel,
        out_shape=jax.ShapeDtypeStruct((1, padded), x.dtype),
        grid=(num_tiles,),
        in_specs=[
            # x: tiled over batch; ragged last tile reads undefined pad rows,
            # which is safe because the reduction is strictly row-local and
            # those output positions are sliced off below.
            pl.BlockSpec((tm, input_dim), lambda i: (i, 0)),
            # weight: resident (same block every step -> no re-DMA).
            pl.BlockSpec((1, input_dim), lambda i: (0, 0)),
            # bias: scalar in SMEM.
            pl.BlockSpec(memory_space=pltpu.MemorySpace.SMEM),
        ],
        # Lane-dense output: one (1, TM) row block per grid step.
        out_specs=pl.BlockSpec((1, tm), lambda i: (0, i)),
        compiler_params=pltpu.CompilerParams(
            dimension_semantics=("parallel",),  # batch axis -> megacore on v7x
            vmem_limit_bytes=int(vmem_limit),
        ),
        cost_estimate=cost,
    )(x, weight, bias)

    # Drop pad rows from the ragged last tile and restore (batch, 1) layout.
    return out[0, :batch].reshape(batch, 1)


if __name__ == "__main__":
    key = jax.random.PRNGKey(0)
    kx, kw, kb = jax.random.split(key, 3)

    # Multi-tile, lane-dense path (2 grid steps, TM = 128).
    batch, input_dim = 256, 128
    x = jax.random.normal(kx, (batch, input_dim), dtype=jnp.float32)
    weight = jax.random.normal(kw, (1, input_dim), dtype=jnp.float32) * 0.1
    bias = jax.random.normal(kb, (1,), dtype=jnp.float32) * 0.1

    y = jax.block_until_ready(linear_forward(x, weight, bias))
    y_ref = x @ weight.T + bias
    assert y.shape == (batch, 1)
    assert jnp.allclose(y, y_ref, atol=1e-4, rtol=1e-4), "mismatch vs reference (large)"

    # Small single-tile path with full-extent blocks (torch-demo-like shape).
    xs = jax.random.normal(kx, (8, 32), dtype=jnp.float32)
    ws = jax.random.normal(kw, (1, 32), dtype=jnp.float32) * 0.1
    bs = jax.random.normal(kb, (1,), dtype=jnp.float32) * 0.1
    ys = jax.block_until_ready(linear_forward(xs, ws, bs))
    assert ys.shape == (8, 1)
    assert jnp.allclose(ys, xs @ ws.T + bs, atol=1e-5, rtol=1e-5), "mismatch vs reference (small)"

    print("KERNEL_OK")
</pallas_src>

<mosaic_0001>
module attributes {stable_mosaic.version = 11 : i64} {
  func.func @linear_kernel(%arg0: i32, %arg1: memref<128x128xf32, #tpu.memory_space<vmem>>, %arg2: memref<1x128xf32, #tpu.memory_space<vmem>>, %arg3: memref<1xf32, #tpu.memory_space<smem>>, %arg4: memref<1x128xf32, #tpu.memory_space<vmem>>) attributes {dimension_semantics = [#tpu.dimension_semantics<parallel>], iteration_bounds = array<i64: 2>, scalar_prefetch = 0 : i64, scratch_operands = 0 : i64, tpu.core_type = #tpu.core_type<tc>, window_params = [{transform_indices = @transform_0, window_bounds = array<i64: 128, 128>}, {pipeline_mode = #tpu.pipeline_mode<synchronous>, transform_indices = @transform_1, window_bounds = array<i64: 1, 128>}, {transform_indices = @transform_2, window_bounds = array<i64: 1>}, {transform_indices = @transform_3, window_bounds = array<i64: 1, 128>}]} {
    %c0 = arith.constant 0 : index
    %c0_0 = arith.constant 0 : index
    %0 = vector.load %arg1[%c0, %c0_0] : memref<128x128xf32, #tpu.memory_space<vmem>>, vector<128x128xf32>
    %c0_1 = arith.constant 0 : index
    %c0_2 = arith.constant 0 : index
    %1 = vector.load %arg2[%c0_1, %c0_2] : memref<1x128xf32, #tpu.memory_space<vmem>>, vector<1x128xf32>
    %2 = vector.broadcast %1 : vector<1x128xf32> to vector<128x128xf32>
    %3 = arith.mulf %0, %2 : vector<128x128xf32>
    %cst = arith.constant dense<0.000000e+00> : vector<128xf32>
    %4 = vector.multi_reduction <add>, %3, %cst [1] : vector<128x128xf32> to vector<128xf32>
    %c0_3 = arith.constant 0 : index
    %5 = memref.load %arg3[%c0_3] : memref<1xf32, #tpu.memory_space<smem>>
    %6 = vector.broadcast %5 : f32 to vector<128xf32>
    %7 = arith.addf %4, %6 : vector<128xf32>
    %8 = vector.shape_cast %7 : vector<128xf32> to vector<1x128xf32>
    %c0_4 = arith.constant 0 : index
    %c0_5 = arith.constant 0 : index
    %9 = vector.load %arg4[%c0_4, %c0_5] : memref<1x128xf32, #tpu.memory_space<vmem>>, vector<1x128xf32>
    tpu.vector_store %arg4[%c0_4, %c0_5], %8 {strides = array<i32>} : memref<1x128xf32, #tpu.memory_space<vmem>>, vector<1x128xf32>,
    return
  }
  func.func @transform_0(%arg0: i32) -> (i32, i32) {
    %c0_i32 = arith.constant 0 : i32
    %c0_i32_0 = arith.constant 0 : i32
    return %arg0, %c0_i32 : i32, i32
  }
  func.func @transform_1(%arg0: i32) -> (i32, i32) {
    %c0_i32 = arith.constant 0 : i32
    %c0_i32_0 = arith.constant 0 : i32
    %c0_i32_1 = arith.constant 0 : i32
    return %c0_i32, %c0_i32_0 : i32, i32
  }
  func.func @transform_2(%arg0: i32) -> i32 {
    %c0_i32 = arith.constant 0 : i32
    %c0_i32_0 = arith.constant 0 : i32
    return %c0_i32 : i32
  }
  func.func @transform_3(%arg0: i32) -> (i32, i32) {
    %c0_i32 = arith.constant 0 : i32
    %c0_i32_0 = arith.constant 0 : i32
    return %c0_i32, %arg0 : i32, i32
  }
}

</mosaic_0001>

<bundles_post_ra>
// kernel: tpu_custom_call.1
= control target key start
LH: loop header
LB: loop body
LE: loop exit
PB: predicated region body
PF: predicated region fallthrough
CT: control target
= control target key end

     0   :  { %s806_s0 = inlined_call_operand.hbm [shape: f32[256,128], index: 0, kind: input, shape index: {}]   ;;  %s807_s1 = inlined_call_operand.vmem [shape: f32[1,128], index: 1, kind: input, shape index: {}]   ;;  %s808_s2 = inlined_call_operand.<no memory space> [shape: f32[1], index: 2, kind: input, shape index: {}]   ;;  %s809_s3 = inlined_call_operand.hbm [shape: f32[1,256], index: 3, kind: output, shape index: {}]  }
   0x1   :  { %8 = sst [smem:[#allocation2]] %s808_s2 }
   0x2   :  { %9 = vsyncpa [#allocation4], 0 }
   0x3   :  { %11 = vsyncpa [#allocation4 + $0x1], 0 }
   0x4   :  { %12 = vsyncpa [#allocation5], 0 }
   0x5   :  { %14 = vsyncpa [#allocation5 + $0x1], 0  ;;  %s621_s14 = smov 0   ;;  %s623_s15 = smov 0  }
   0x6   :  { %s625_s16 = smov 0   ;;  %s627_s17 = smov 0  }
   0x7 LB: > { %s642_s2 = sadd.s32 4294967295, %s594_s17   ;;  %s438_s18 = sadd.s32 4294967294, %s594_s17   ;;  %s594_s17 = sphi %s627_s17, %s819_s17   ;;  %s590_s16 = sphi %s625_s16, %s818_s16   ;;  %s586_s15 = sphi %s623_s15, %s817_s15   ;;  %s582_s14 = sphi %s621_s14, %s816_s14  }
   0x8   : > { %s646_s19 = sadd.s32 1, %s594_s17   ;;  %s27_s20 = sadd.s32 1, %s590_s16 }
   0x9   : > { %s24_s21 = ssub.s32 %s594_s17, %s646_s19  ;;  %p34_p0 = scmp.ne.s32.totalorder %s590_s16, %s586_s15 }
   0xa   : > { %p25_p1 = scmp.eq.s32.totalorder %s24_s21, 0  ;;  %p35_p2 = scmp.eq.s32.totalorder %s594_s17, 0 }
   0xb   : > { %p40_p3 = scmp.ne.s32.totalorder %s586_s15, %s582_s14  ;;  %p41_p4 = scmp.eq.s32.totalorder %s642_s2, 0 }
   0xc   : > { %s658_s22 = scalar_select %p25_p1, %s590_s16, %s27_s20  }
   0xd   : > { %p660_p5 = por %p35_p2, %p34_p0  ;;  %p664_p6 = por %p41_p4, %p40_p3 }
   0xe   : > { %p106_p7 = scmp.eq.s32.totalorder %s642_s2, 1  ;;  %p112_p8 = scmp.eq.s32.totalorder %s438_s18, 1 }
   0xf   : > { %p461_p10 = scmp.lt.s32.totalorder %s594_s17, 2  ;;  %s138_s27 = sand.u32 1, %s590_s16  }
  0x10   : > { %p671_p11 = por %p106_p7, %p34_p0  ;;  %p675_p12 = por %p112_p8, %p40_p3 }
  0x11   : > { %s448_s28 = sshll.u32 %s594_s17, 7  ;;  %s441_s29 = sshll.u32 %s138_s27, 7 }
  0x12   : > { %s147_s5 = scalar_lea.hbm %s806_s0, %s448_s28  ;;  %s142_s7 = scalar_lea.vmem [#allocation3], %s441_s29 }
  0x13   : > { %s148_s6 = sshll.u32 %s147_s5, 4  ;;  %s150_s8 = sshll.u32 %s142_s7, 4  ;;  %s149_s6 = int_to_ptr.hbm [resolvable:$true] %s148_s6  ;;  %s151_s8 = int_to_ptr.vmem [resolvable:$true] %s150_s8 }
  0x14   : > { %p686_p13 = pnand %p461_p10, %p660_p5  ;;  %p444_p0 = scmp.ge.s32.totalorder %s594_s17, 1 }
  0x15   : > { %p158_p1 = scmp.lt.s32.totalorder %s594_s17, 3  ;;  %s139_s10 = scalar_lea.sflag [#allocation4], %s138_s27 }
  0x16   : > { %s498_s11 = sshra.s32 %s149_s6, 4  ;;  %p502_p3 = pneg %p686_p13  ;;  %s499_s11 = int_to_ptr.hbm [resolvable:$true] %s498_s11 }
  0x17   : > { %s500_s12 = scalar_lea.hbm %s499_s11, 128  ;;  %s505_s20 = scalar_lea.hbm %s806_s0, 256 }
  0x18   : > { %p501_p2 = scmp.ne.s32.totalorder %s499_s11, %s500_s12  ;;  %p506_p5 = scmp.lt.s32.totalorder %s499_s11, %s806_s0 }
  0x19   : > { %p507_p8 = scmp.lt.s32.totalorder %s505_s20, %s500_s12 }
  0x1a   : > { %p503_p4 = pnand %p502_p3, %p501_p2 }
  0x1b   : > { %p508_p10 = por %p507_p8, %p506_p5 }
  0x1c   : > { %p504_p7 = pneg %p503_p4 }
  0x1e   : > { %p509_p9 = pnand %p508_p10, %p504_p7 }
  0x20   : > { %512 = shalt.err (!%p509_p9)
}
  0x21   : > { %s596_s27 = smov 128   ;;  %s597_s28 = smov 8  }
  0x22   : > { %456 = dma.hbm_to_vmem [thread:$0]  (!%p686_p13), %s149_s6, 2048, %s151_s8, %s139_s10, %s596_s27, %s596_s27, %s597_s28  }
  0x23   : > { %p159_p2 = pnand %p444_p0, %p158_p1 }
  0x24   : > { %s707_s29 = sand.u32 (!%p159_p2), 1, %s586_s15  }
  0x25   : > { %162 = sbr.rel (%p159_p2) target bundleno = 211 (0xd3), region = 32  ;;  %s445_s30 = sshll.u32 (!%p159_p2), %s707_s29, 7 }
  0x26   : > { %s165_s4 = scalar_lea.sflag (!%p159_p2), [#allocation4], %s707_s29  ;;  %s711_s5 = scalar_lea.vmem (!%p159_p2), [#allocation3], %s445_s30 }
  0x2a   : > { %573 = dma.done.wait (%p664_p6), %s165_s4, 2048  }
  0x2b   : > { %575 = vsyncadd (%p664_p6), %s165_s4, 4294965248  ;;  %v192_v0 = vld [vmem:[%s711_s5] sm:$0xff]  ;;  %v194_v2 = vld [vmem:[%s711_s5 + $0x10] sm:$0xff]  ;;  %s260_s24 = sld [smem:[#allocation2]]  ;;  %v294_v35 = vlaneseq  ;;  %vm299_vm0 = vcmask 130112   ;;  %vm303_vm1 = vcmask 195712   ;;  %s368_s10 = scalar_lea.hbm %s809_s3, %s642_s2 }
  0x2c   : > { %v497_v1 = vld [vmem:[%s807_s1] ss:$0 sm:$0xff]  ;;  %v193_v7 = vld [vmem:[%s711_s5 + $0x8] sm:$0xff]  ;;  %v195_v8 = vld [vmem:[%s711_s5 + $0x18] sm:$0xff]  ;;  %vm307_vm2 = vcmask 261312   ;;  %vm311_vm3 = vcmask 326912  }
  0x2d   : > { %v196_v3 = vld [vmem:[%s711_s5 + $0x20] sm:$0xff]  ;;  %v212_v4 = vmul.f32 %v497_v1, %v192_v0  ;;  %v214_v5 = vmul.f32 %v497_v1, %v194_v2  ;;  %v197_v9 = vld [vmem:[%s711_s5 + $0x28] sm:$0xff]  ;;  %v213_v10 = vmul.f32 %v497_v1, %v193_v7  ;;  %v215_v11 = vmul.f32 %v497_v1, %v195_v8  ;;  %v198_v13 = vld [vmem:[%s711_s5 + $0x30] sm:$0xff]  ;;  %s190_s11 = scalar_lea.vmem [#allocation6], %s707_s29  ;;  %s372_s13 = sshll.u32 %s368_s10, 4  ;;  %s373_s13 = int_to_ptr.hbm [resolvable:$true] %s372_s13 }
  0x2e   : > { %v216_v6 = vmul.f32 %v497_v1, %v196_v3  ;;  %v217_v12 = vmul.f32 %v497_v1, %v197_v9  ;;  %v199_v14 = vld [vmem:[%s711_s5 + $0x38] sm:$0xff]  ;;  %v200_v15 = vld [vmem:[%s711_s5 + $0x40] sm:$0xff]  ;;  %v218_v16 = vmul.f32 %v497_v1, %v198_v13  ;;  %v201_v19 = vld [vmem:[%s711_s5 + $0x48] sm:$0xff]  ;;  %v738_v38 = vand.u32 127, %v294_v35  ;;  %s370_s12 = sshll.u32 %s190_s11, 4  ;;  %s360_s2 = scalar_lea.sflag [#allocation5], %s707_s29  ;;  %s371_s12 = int_to_ptr.vmem [resolvable:$true] %s370_s12 }
  0x2f   : > { %228 = vadd.xlane.f32.xlu0 %v212_v4  ;;  %232 = vadd.xlane.f32.xlu1 %v214_v5  ;;  %v219_v17 = vmul.f32 %v497_v1, %v199_v14  ;;  %v220_v18 = vmul.f32 %v497_v1, %v200_v15  ;;  %v202_v20 = vld [vmem:[%s711_s5 + $0x50] sm:$0xff]  ;;  %v203_v21 = vld [vmem:[%s711_s5 + $0x58] sm:$0xff]  ;;  %v221_v22 = vmul.f32 %v497_v1, %v201_v19  ;;  %v204_v25 = vld [vmem:[%s711_s5 + $0x60] sm:$0xff]  ;;  %vm315_vm4 = vcmask 392512   ;;  %s542_s18 = sshra.s32 %s373_s13, 4  ;;  %s548_s27 = scalar_lea.hbm %s809_s3, 2  ;;  %s543_s18 = int_to_ptr.hbm [resolvable:$true] %s542_s18 }
  0x30   : > { %236 = vadd.xlane.f32.xlu2 %v216_v6  ;;  %v222_v23 = vmul.f32 %v497_v1, %v202_v20  ;;  %v223_v24 = vmul.f32 %v497_v1, %v203_v21  ;;  %v205_v26 = vld [vmem:[%s711_s5 + $0x68] sm:$0xff]  ;;  %v206_v27 = vld [vmem:[%s711_s5 + $0x70] sm:$0xff]  ;;  %v224_v28 = vmul.f32 %v497_v1, %v204_v25  ;;  %v207_v31 = vld [vmem:[%s711_s5 + $0x78] sm:$0xff]  ;;  %v297_v40 = vadd.s32 4294967288, %v738_v38  ;;  %s544_s20 = scalar_lea.hbm %s543_s18, 1  ;;  %p549_p0 = scmp.lt.s32.totalorder %s543_s18, %s809_s3 }
  0x31   : > { %v225_v29 = vmul.f32 %v497_v1, %v205_v26  ;;  %v226_v30 = vmul.f32 %v497_v1, %v206_v27  ;;  %v227_v32 = vmul.f32 %v497_v1, %v207_v31  ;;  %v736_v37 = vstv %s260_s24  ;;  %p545_p6 = scmp.ne.s32.totalorder %s543_s18, %s544_s20  ;;  %p550_p1 = scmp.lt.s32.totalorder %s548_s27, %s544_s20 }
  0x32   : > { %v301_v41 = vadd.s32 4294967280, %v738_v38  ;;  %v305_v46 = vadd.s32 4294967272, %v738_v38  ;;  %v309_v54 = vadd.s32 4294967264, %v738_v38  ;;  %v313_v57 = vadd.s32 4294967256, %v738_v38 }
  0x33   : > { %v317_v59 = vadd.s32 4294967248, %v738_v38  ;;  %v321_v3 = vadd.s32 4294967240, %v738_v38  ;;  %vm319_vm5 = vcmask 458112   ;;  %v325_v7 = vadd.s32 4294967232, %v738_v38  ;;  %p546_p9 = pnand %p545_p6, %p671_p11  ;;  %p551_p3 = por %p550_p1, %p549_p0 }
  0x34   : > { %vm323_vm6 = vcmask 523712   ;;  %vm327_vm7 = vcmask 589312   ;;  %vm331_vm8 = vcmask 654912   ;;  %vm335_vm9 = vcmask 720512  }
  0x35   : > { %v341_v27 = vadd.s32 4294967200, %v738_v38  ;;  %vm339_vm10 = vcmask 786112   ;;  %vm343_vm11 = vcmask 851712   ;;  %vm347_vm12 = vcmask 917312   ;;  %p547_p13 = pneg %p546_p9 }
  0x36   : > { %vm351_vm13 = vcmask 982912   ;;  %vm355_vm14 = vcmask 1048512  }
  0x37   : > { %230 = vadd.xlane.f32.xlu0 %v213_v10  ;;  %234 = vadd.xlane.f32.xlu1 %v215_v11  ;;  %v329_v11 = vadd.s32 4294967224, %v738_v38  ;;  %p552_p4 = pnand %p551_p3, %p547_p13 }
  0x38   : > { %238 = vadd.xlane.f32.xlu2 %v217_v12 }
  0x3f   : > { %240 = vadd.xlane.f32.xlu0 %v218_v16  ;;  %242 = vadd.xlane.f32.xlu1 %v219_v17 }
  0x40   : > { %244 = vadd.xlane.f32.xlu2 %v220_v18  ;;  %v333_v18 = vadd.s32 4294967216, %v738_v38 }
  0x47   : > { %246 = vadd.xlane.f32.xlu0 %v221_v22  ;;  %248 = vadd.xlane.f32.xlu1 %v222_v23  ;;  %v337_v22 = vadd.s32 4294967208, %v738_v38 }
  0x48   : > { %250 = vadd.xlane.f32.xlu2 %v223_v24 }
  0x4f   : > { %252 = vadd.xlane.f32.xlu0 %v224_v28  ;;  %254 = vadd.xlane.f32.xlu1 %v225_v29 }
  0x50   : > { %256 = vadd.xlane.f32.xlu2 %v226_v30 }
  0x57   : > { %258 = vadd.xlane.f32.xlu0 %v227_v32  ;;  %v345_v32 = vadd.s32 4294967192, %v738_v38 }
  0xa2   : > { %v229_v33 = vpop.xlane.xlu0 %228  ;;  %v233_v34 = vpop.xlane.xlu1 %232 }
  0xa3   : > { %v237_v36 = vpop.xlane.xlu2 %236  ;;  %v262_v39 = vadd.f32 %v736_v37, %v229_v33  ;;  %v264_v42 = vadd.f32 %v736_v37, %v233_v34 }
  0xa4   : > { %v266_v55 = vadd.f32 %v736_v37, %v237_v36 }
  0xa5   : > { %v296_v49 = vperm.slane %v262_v39, %v738_v38  ;;  %v302_v51 = vperm.slane %v264_v42, %v301_v41  ;;  %v349_v39 = vadd.s32 4294967184, %v738_v38 }
  0xa6   : > { %v310_v1 = vperm.slane %v266_v55, %v309_v54 }
  0xaa   : > { %v231_v43 = vpop.xlane.xlu0 %230  ;;  %v235_v44 = vpop.xlane.xlu1 %234 }
  0xab   : > { %v263_v45 = vadd.f32 %v736_v37, %v231_v43  ;;  %v265_v47 = vadd.f32 %v736_v37, %v235_v44  ;;  %v239_v48 = vpop.xlane.xlu2 %238  ;;  %v353_v44 = vadd.s32 4294967176, %v738_v38 }
  0xac   : > { %v267_v58 = vadd.f32 %v736_v37, %v239_v48 }
  0xad   : > { %v298_v50 = vperm.slane %v263_v45, %v297_v40  ;;  %v306_v53 = vperm.slane %v265_v47, %v305_v46 }
  0xae   : > { %v314_v2 = vperm.slane %v267_v58, %v313_v57 }
  0xaf   : > { %v300_v52 = vsel %vm299_vm0, %v298_v50, %v296_v49 }
  0xb0   : > { %v304_v56 = vsel %vm303_vm1, %v302_v51, %v300_v52 }
  0xb1   : > { %v308_v62 = vsel %vm307_vm2, %v306_v53, %v304_v56 }
  0xb2   : > { %v241_v60 = vpop.xlane.xlu0 %240  ;;  %v243_v61 = vpop.xlane.xlu1 %242  ;;  %v312_v5 = vsel %vm311_vm3, %v310_v1, %v308_v62 }
  0xb3   : > { %v268_v63 = vadd.f32 %v736_v37, %v241_v60  ;;  %v245_v0 = vpop.xlane.xlu2 %244  ;;  %v269_v4 = vadd.f32 %v736_v37, %v243_v61  ;;  %v316_v9 = vsel %vm315_vm4, %v314_v2, %v312_v5 }
  0xb4   : > { %v270_v8 = vadd.f32 %v736_v37, %v245_v0 }
  0xb5   : > { %v318_v6 = vperm.slane %v268_v63, %v317_v59  ;;  %v322_v10 = vperm.slane %v269_v4, %v321_v3 }
  0xb6   : > { %v326_v17 = vperm.slane %v270_v8, %v325_v7 }
  0xb7   : > { %v320_v12 = vsel %vm319_vm5, %v318_v6, %v316_v9 }
  0xb8   : > { %v324_v20 = vsel %vm323_vm6, %v322_v10, %v320_v12 }
  0xb9   : > { %v328_v24 = vsel %vm327_vm7, %v326_v17, %v324_v20 }
  0xba   : > { %v247_v13 = vpop.xlane.xlu0 %246  ;;  %v249_v14 = vpop.xlane.xlu1 %248 }
  0xbb   : > { %v271_v15 = vadd.f32 %v736_v37, %v247_v13  ;;  %v251_v16 = vpop.xlane.xlu2 %250  ;;  %v272_v19 = vadd.f32 %v736_v37, %v249_v14 }
  0xbc   : > { %v273_v23 = vadd.f32 %v736_v37, %v251_v16 }
  0xbd   : > { %v330_v21 = vperm.slane %v271_v15, %v329_v11  ;;  %v334_v25 = vperm.slane %v272_v19, %v333_v18 }
  0xbe   : > { %v338_v30 = vperm.slane %v273_v23, %v337_v22 }
  0xbf   : > { %v332_v26 = vsel %vm331_vm8, %v330_v21, %v328_v24 }
  0xc0   : > { %v336_v35 = vsel %vm335_vm9, %v334_v25, %v332_v26 }
  0xc1   : > { %v340_v41 = vsel %vm339_vm10, %v338_v30, %v336_v35 }
  0xc2   : > { %v253_v28 = vpop.xlane.xlu0 %252  ;;  %v255_v29 = vpop.xlane.xlu1 %254 }
  0xc3   : > { %v274_v31 = vadd.f32 %v736_v37, %v253_v28  ;;  %v275_v33 = vadd.f32 %v736_v37, %v255_v29  ;;  %v257_v34 = vpop.xlane.xlu2 %256 }
  0xc4   : > { %v276_v40 = vadd.f32 %v736_v37, %v257_v34 }
  0xc5   : > { %v342_v36 = vperm.slane %v274_v31, %v341_v27  ;;  %v346_v42 = vperm.slane %v275_v33, %v345_v32 }
  0xc6   : > { %v350_v45 = vperm.slane %v276_v40, %v349_v39 }
  0xc7   : > { %v344_v43 = vsel %vm343_vm11, %v342_v36, %v340_v41 }
  0xc8   : > { %v348_v47 = vsel %vm347_vm12, %v346_v42, %v344_v43 }
  0xc9   : > { %v352_v50 = vsel %vm351_vm13, %v350_v45, %v348_v47 }
  0xca   : > { %v259_v46 = vpop.xlane.xlu0 %258 }
  0xcb   : > { %v277_v48 = vadd.f32 %v736_v37, %v259_v46 }
  0xcd   : > { %v354_v49 = vperm.slane %v277_v48, %v353_v44 }
  0xcf   : > { %v356_v51 = vsel %vm355_vm14, %v354_v49, %v352_v50 }
  0xd0   : > { %358 = vst [vmem:[%s190_s11] sm:$0x1] %v356_v51 }
  0xd1   : > { %555 = shalt.err (!%p552_p4)
}
  0xd2   : > { %451 = dma.vmem_to_hbm [thread:$0]  (%p671_p11), %s371_s12, 16, %s373_s13, %s360_s2  }
  0xd3 PF: > { %s384_s29 = sand.u32 1, %s582_s14   ;;  %p815_p7 = scmp.ge.s32.totalorder %s594_s17, 2 }
  0xd4   : > { %s385_s4 = scalar_lea.sflag [#allocation5], %s384_s29 }
  0xd5   : > { %p458_p5 = pnand %p815_p7, %p675_p12 }
  0xd7   : > { %p459_p8 = pneg %p458_p5 }
  0xd9   : > { %577 = dma.done.wait (%p459_p8), %s385_s4, 16  }
  0xda   : > { %579 = vsyncadd (%p459_p8), %s385_s4, 4294967280  ;;  %p17_p10 = scmp.ge.s32.totalorder %s646_s19, 4   ;;  %s816_s14 = smov %s586_s15 }
  0xdb   : > { %s817_s15 = smov %s590_s16  ;;  %s818_s16 = smov %s658_s22 }
  0xdc   : > { %s819_s17 = smov %s646_s19  ;;  %19 = sbr.rel (!%p17_p10) target bundleno = 7 (0x7), region = 77 }
  0xe1   :  { %390 = vsyncpa [#allocation4], 1 }
  0xe2   :  { %392 = vsyncpa [#allocation4 + $0x1], 1 }
  0xe3   :  { %393 = vsyncpa [#allocation5], 1 }
  0xe4   :  { %395 = vsyncpa [#allocation5 + $0x1], 1 }

</bundles_post_ra>
